<compile_context>
chip_gen: v5e
topology: v5e:2x2
jax: 0.10.0
libtpu: 0.0.40
codegen_flags: <defaults>
</compile_context>

<pallas_src>
import jax
import jax.numpy as jnp
from jax.experimental import pallas as pl
from jax.experimental.pallas import tpu as pltpu

ACTION_SIZE = 2
HIDDEN1 = 256
HIDDEN2 = 128
HEAD_W = 8            # fused (mean0, mean1, value, pad...) head width


def _round_up(x, m):
    return ((x + m - 1) // m) * m


def actor_critic_kernel(obs_ref, w1_ref, b1_ref, w2_ref, b2_ref,
                        wh_ref, bh_ref, out_ref):
    # Layers 1-2: bf16 MXU inputs, f32 accumulation + bias + tanh.
    obs = obs_ref[...].astype(jnp.bfloat16)
    h1 = jnp.tanh(jnp.dot(obs, w1_ref[...],
                          preferred_element_type=jnp.float32) + b1_ref[...])
    h2 = jnp.tanh(jnp.dot(h1.astype(jnp.bfloat16), w2_ref[...],
                          preferred_element_type=jnp.float32) + b2_ref[...])

    # Fused heads in f32 (critic value is unbounded -> keep full precision):
    #   cols [0, ACTION_SIZE)  -> actor mean (tanh applied)
    #   col  ACTION_SIZE       -> critic value (no tanh)
    #   remaining cols         -> zero padding
    heads = jnp.dot(h2, wh_ref[...],
                    preferred_element_type=jnp.float32) + bh_ref[...]
    lane = jax.lax.broadcasted_iota(jnp.int32, heads.shape, 1)
    out_ref[...] = jnp.where(lane < ACTION_SIZE, jnp.tanh(heads), heads)


def _choose_tile(B, tb):
    """Batch tile: multiple of 128 (or == B) and >=2 grid steps when B >= 256."""
    tb = max(128, (tb // 128) * 128)
    if B < 256:
        return B                                   # single full-dim tile
    two_steps = _round_up(pl.cdiv(B, 2), 128)      # keep both v7x cores busy
    return min(tb, two_steps)


def actor_critic_forward(obs, params, *, tb=1024):
    """obs: [B, obs_size] float32. params: dict of weights (PyTorch layout).

    Returns (mean [B,2], log_std [B,2], value [B,1]) in float32.
    """
    B, D = obs.shape
    TB = _choose_tile(B, tb)
    grid = (pl.cdiv(B, TB),)

    # ---- weight prep (tiny, one-time layout plumbing) ------------------------
    w1 = params["w1"].T.astype(jnp.bfloat16)                      # [D, 256]
    w2 = params["w2"].T.astype(jnp.bfloat16)                      # [256, 128]
    b1 = params["b1"].reshape(1, -1).astype(jnp.float32)          # [1, 256]
    b2 = params["b2"].reshape(1, -1).astype(jnp.float32)          # [1, 128]

    # Fused narrow head: [128, 8] f32 / [1, 8] f32, zero padded.
    wh = jnp.zeros((HIDDEN2, HEAD_W), jnp.float32)
    wh = wh.at[:, :ACTION_SIZE].set(params["w3"].T.astype(jnp.float32))
    wh = wh.at[:, ACTION_SIZE:ACTION_SIZE + 1].set(
        params["wc"].T.astype(jnp.float32))
    bh = jnp.zeros((1, HEAD_W), jnp.float32)
    bh = bh.at[0, :ACTION_SIZE].set(params["b3"].astype(jnp.float32))
    bh = bh.at[0, ACTION_SIZE].set(params["bc"][0].astype(jnp.float32))

    const = lambda i: (0, 0)   # weights: same block every step (VMEM-resident)

    flops = 2 * B * (D * HIDDEN1 + HIDDEN1 * HIDDEN2 + HIDDEN2 * HEAD_W)
    transcendentals = B * (HIDDEN1 + HIDDEN2 + HEAD_W)
    bytes_accessed = (B * D * 4 + B * HEAD_W * 4
                      + (D * HIDDEN1 + HIDDEN1 * HIDDEN2) * 2
                      + (HIDDEN1 + HIDDEN2 + HIDDEN2 * HEAD_W + HEAD_W) * 4)

    out = pl.pallas_call(
        actor_critic_kernel,
        out_shape=jax.ShapeDtypeStruct((B, HEAD_W), jnp.float32),
        grid_spec=pl.GridSpec(
            grid=grid,
            in_specs=[
                pl.BlockSpec((TB, D), lambda i: (i, 0)),         # obs tile (f32)
                pl.BlockSpec((D, HIDDEN1), const),               # w1 (bf16)
                pl.BlockSpec((1, HIDDEN1), const),               # b1
                pl.BlockSpec((HIDDEN1, HIDDEN2), const),         # w2 (bf16)
                pl.BlockSpec((1, HIDDEN2), const),               # b2
                pl.BlockSpec((HIDDEN2, HEAD_W), const),          # fused head W (f32)
                pl.BlockSpec((1, HEAD_W), const),                # fused head b
            ],
            out_specs=pl.BlockSpec((TB, HEAD_W), lambda i: (i, 0)),
        ),
        compiler_params=pltpu.CompilerParams(
            dimension_semantics=("parallel",)),
        cost_estimate=pl.CostEstimate(
            flops=flops,
            transcendentals=transcendentals,
            bytes_accessed=bytes_accessed),
    )(obs, w1, b1, w2, b2, wh, bh)

    mean = out[:, :ACTION_SIZE]
    val = out[:, ACTION_SIZE:ACTION_SIZE + 1]
    lstd = jnp.broadcast_to(params["log_std"].astype(jnp.float32), mean.shape)
    return mean, lstd, val


def init_params(obs_size, key):
    """Deterministic synthetic init (same shapes as the PyTorch module)."""
    ks = jax.random.split(key, 8)

    def lin(kw, kb, fan_in, fan_out):
        bound = 1.0 / jnp.sqrt(fan_in)
        w = jax.random.uniform(kw, (fan_out, fan_in), jnp.float32, -bound, bound)
        b = jax.random.uniform(kb, (fan_out,), jnp.float32, -bound, bound)
        return w, b

    w1, b1 = lin(ks[0], ks[1], obs_size, HIDDEN1)
    w2, b2 = lin(ks[2], ks[3], HIDDEN1, HIDDEN2)
    w3, b3 = lin(ks[4], ks[5], HIDDEN2, ACTION_SIZE)
    wc, bc = lin(ks[6], ks[7], HIDDEN2, 1)
    log_std = jnp.full((ACTION_SIZE,), -0.5, dtype=jnp.float32)
    return dict(w1=w1, b1=b1, w2=w2, b2=b2, w3=w3, b3=b3,
                wc=wc, bc=bc, log_std=log_std)


def reference_forward(obs, p):
    h = jnp.tanh(obs @ p["w1"].T + p["b1"])
    h = jnp.tanh(h @ p["w2"].T + p["b2"])
    mean = jnp.tanh(h @ p["w3"].T + p["b3"])
    lstd = jnp.broadcast_to(p["log_std"], mean.shape)
    val = h @ p["wc"].T + p["bc"]
    return mean, lstd, val


if __name__ == "__main__":
    key = jax.random.PRNGKey(0)
    k_obs, k_par = jax.random.split(key)

    B, OBS_SIZE = 8, 32
    obs = jax.random.normal(k_obs, (B, OBS_SIZE), dtype=jnp.float32)
    params = init_params(OBS_SIZE, k_par)

    mean, lstd, val = actor_critic_forward(obs, params)
    jax.block_until_ready((mean, lstd, val))

    # Sanity check against a pure-JAX f32 reference (layers 1-2 use bf16 MXU
    # inputs with f32 accumulation, so use a loose tolerance).
    mean_r, lstd_r, val_r = reference_forward(obs, params)
    assert mean.shape == (B, ACTION_SIZE)
    assert lstd.shape == (B, ACTION_SIZE)
    assert val.shape == (B, 1)
    assert jnp.allclose(mean, mean_r, atol=5e-2)
    assert jnp.allclose(lstd, lstd_r, atol=1e-6)
    assert jnp.allclose(val, val_r, atol=5e-2)

    print("KERNEL_OK")
</pallas_src>

<mosaic_0001>
module attributes {stable_mosaic.version = 11 : i64} {
  func.func @actor_critic_kernel(%arg0: i32, %arg1: memref<8x32xf32, #tpu.memory_space<vmem>>, %arg2: memref<32x256xbf16, #tpu.memory_space<vmem>>, %arg3: memref<1x256xf32, #tpu.memory_space<vmem>>, %arg4: memref<256x128xbf16, #tpu.memory_space<vmem>>, %arg5: memref<1x128xf32, #tpu.memory_space<vmem>>, %arg6: memref<128x8xf32, #tpu.memory_space<vmem>>, %arg7: memref<1x8xf32, #tpu.memory_space<vmem>>, %arg8: memref<8x8xf32, #tpu.memory_space<vmem>>) attributes {dimension_semantics = [#tpu.dimension_semantics<parallel>], iteration_bounds = array<i64: 1>, scalar_prefetch = 0 : i64, scratch_operands = 0 : i64, tpu.core_type = #tpu.core_type<tc>, window_params = [{transform_indices = @transform_0, window_bounds = array<i64: 8, 32>}, {pipeline_mode = #tpu.pipeline_mode<synchronous>, transform_indices = @transform_1, window_bounds = array<i64: 32, 256>}, {pipeline_mode = #tpu.pipeline_mode<synchronous>, transform_indices = @transform_2, window_bounds = array<i64: 1, 256>}, {pipeline_mode = #tpu.pipeline_mode<synchronous>, transform_indices = @transform_3, window_bounds = array<i64: 256, 128>}, {pipeline_mode = #tpu.pipeline_mode<synchronous>, transform_indices = @transform_4, window_bounds = array<i64: 1, 128>}, {pipeline_mode = #tpu.pipeline_mode<synchronous>, transform_indices = @transform_5, window_bounds = array<i64: 128, 8>}, {pipeline_mode = #tpu.pipeline_mode<synchronous>, transform_indices = @transform_6, window_bounds = array<i64: 1, 8>}, {transform_indices = @transform_7, window_bounds = array<i64: 8, 8>}]} {
    %c0 = arith.constant 0 : index
    %c0_0 = arith.constant 0 : index
    %0 = vector.load %arg1[%c0, %c0_0] : memref<8x32xf32, #tpu.memory_space<vmem>>, vector<8x32xf32>
    %1 = arith.truncf %0 : vector<8x32xf32> to vector<8x32xbf16>
    %c0_1 = arith.constant 0 : index
    %c0_2 = arith.constant 0 : index
    %2 = vector.load %arg2[%c0_1, %c0_2] : memref<32x256xbf16, #tpu.memory_space<vmem>>, vector<32x256xbf16>
    %cst = arith.constant dense<0.000000e+00> : vector<8x256xf32>
    %3 = tpu.matmul %1, %2, %cst {dimension_numbers = #tpu.dot_dimension_numbers<[1], [0], [0], [1], [0, 0, 1, 1], [], []>} : vector<8x32xbf16>, vector<32x256xbf16>, vector<8x256xf32> -> vector<8x256xf32>
    %c0_3 = arith.constant 0 : index
    %c0_4 = arith.constant 0 : index
    %4 = vector.load %arg3[%c0_3, %c0_4] : memref<1x256xf32, #tpu.memory_space<vmem>>, vector<1x256xf32>
    %5 = vector.broadcast %4 : vector<1x256xf32> to vector<8x256xf32>
    %6 = arith.addf %3, %5 : vector<8x256xf32>
    %7 = math.tanh %6 : vector<8x256xf32>
    %8 = arith.truncf %7 : vector<8x256xf32> to vector<8x256xbf16>
    %c0_5 = arith.constant 0 : index
    %c0_6 = arith.constant 0 : index
    %9 = vector.load %arg4[%c0_5, %c0_6] : memref<256x128xbf16, #tpu.memory_space<vmem>>, vector<256x128xbf16>
    %cst_7 = arith.constant dense<0.000000e+00> : vector<8x128xf32>
    %10 = tpu.matmul %8, %9, %cst_7 {dimension_numbers = #tpu.dot_dimension_numbers<[1], [0], [0], [1], [0, 0, 1, 1], [], []>} : vector<8x256xbf16>, vector<256x128xbf16>, vector<8x128xf32> -> vector<8x128xf32>
    %c0_8 = arith.constant 0 : index
    %c0_9 = arith.constant 0 : index
    %11 = vector.load %arg5[%c0_8, %c0_9] : memref<1x128xf32, #tpu.memory_space<vmem>>, vector<1x128xf32>
    %12 = vector.broadcast %11 : vector<1x128xf32> to vector<8x128xf32>
    %13 = arith.addf %10, %12 : vector<8x128xf32>
    %14 = math.tanh %13 : vector<8x128xf32>
    %c0_10 = arith.constant 0 : index
    %c0_11 = arith.constant 0 : index
    %15 = vector.load %arg6[%c0_10, %c0_11] : memref<128x8xf32, #tpu.memory_space<vmem>>, vector<128x8xf32>
    %cst_12 = arith.constant dense<0.000000e+00> : vector<8x8xf32>
    %16 = tpu.matmul %14, %15, %cst_12 {dimension_numbers = #tpu.dot_dimension_numbers<[1], [0], [0], [1], [0, 0, 1, 1], [], []>} : vector<8x128xf32>, vector<128x8xf32>, vector<8x8xf32> -> vector<8x8xf32>
    %c0_13 = arith.constant 0 : index
    %c0_14 = arith.constant 0 : index
    %17 = vector.load %arg7[%c0_13, %c0_14] : memref<1x8xf32, #tpu.memory_space<vmem>>, vector<1x8xf32>
    %18 = vector.broadcast %17 : vector<1x8xf32> to vector<8x8xf32>
    %19 = arith.addf %16, %18 : vector<8x8xf32>
    %20 = tpu.iota {dimensions = array<i32: 1>} : vector<8x8xi32>
    %c2_i32 = arith.constant 2 : i32
    %21 = vector.broadcast %c2_i32 : i32 to vector<8x8xi32>
    %22 = arith.cmpi slt, %20, %21 : vector<8x8xi32>
    %23 = math.tanh %19 : vector<8x8xf32>
    %24 = arith.select %22, %23, %19 : vector<8x8xi1>, vector<8x8xf32>
    %c0_15 = arith.constant 0 : index
    %c0_16 = arith.constant 0 : index
    %25 = vector.load %arg8[%c0_15, %c0_16] : memref<8x8xf32, #tpu.memory_space<vmem>>, vector<8x8xf32>
    tpu.vector_store %arg8[%c0_15, %c0_16], %24 {strides = array<i32>} : memref<8x8xf32, #tpu.memory_space<vmem>>, vector<8x8xf32>,
    return
  }
  func.func @transform_0(%arg0: i32) -> (i32, i32) {
    %c0_i32 = arith.constant 0 : i32
    %c0_i32_0 = arith.constant 0 : i32
    return %arg0, %c0_i32 : i32, i32
  }
  func.func @transform_1(%arg0: i32) -> (i32, i32) {
    %c0_i32 = arith.constant 0 : i32
    %c0_i32_0 = arith.constant 0 : i32
    %c0_i32_1 = arith.constant 0 : i32
    return %c0_i32, %c0_i32_0 : i32, i32
  }
  func.func @transform_2(%arg0: i32) -> (i32, i32) {
    %c0_i32 = arith.constant 0 : i32
    %c0_i32_0 = arith.constant 0 : i32
    %c0_i32_1 = arith.constant 0 : i32
    return %c0_i32, %c0_i32_0 : i32, i32
  }
  func.func @transform_3(%arg0: i32) -> (i32, i32) {
    %c0_i32 = arith.constant 0 : i32
    %c0_i32_0 = arith.constant 0 : i32
    %c0_i32_1 = arith.constant 0 : i32
    return %c0_i32, %c0_i32_0 : i32, i32
  }
  func.func @transform_4(%arg0: i32) -> (i32, i32) {
    %c0_i32 = arith.constant 0 : i32
    %c0_i32_0 = arith.constant 0 : i32
    %c0_i32_1 = arith.constant 0 : i32
    return %c0_i32, %c0_i32_0 : i32, i32
  }
  func.func @transform_5(%arg0: i32) -> (i32, i32) {
    %c0_i32 = arith.constant 0 : i32
    %c0_i32_0 = arith.constant 0 : i32
    %c0_i32_1 = arith.constant 0 : i32
    return %c0_i32, %c0_i32_0 : i32, i32
  }
  func.func @transform_6(%arg0: i32) -> (i32, i32) {
    %c0_i32 = arith.constant 0 : i32
    %c0_i32_0 = arith.constant 0 : i32
    %c0_i32_1 = arith.constant 0 : i32
    return %c0_i32, %c0_i32_0 : i32, i32
  }
  func.func @transform_7(%arg0: i32) -> (i32, i32) {
    %c0_i32 = arith.constant 0 : i32
    %c0_i32_0 = arith.constant 0 : i32
    return %arg0, %c0_i32 : i32, i32
  }
}

</mosaic_0001>

<bundles_post_ra>
// kernel: tpu_custom_call.1
= control target key start
LH: loop header
LB: loop body
LE: loop exit
PB: predicated region body
PF: predicated region fallthrough
CT: control target
= control target key end

     0   :  { %12 = vsyncpa [#allocation3], 0  ;;  %s659_s0 = inlined_call_operand.vmem [shape: f32[8,32], index: 0, kind: input, shape index: {}]   ;;  %s660_s1 = inlined_call_operand.hbm [shape: bf16[32,256], index: 1, kind: input, shape index: {}]   ;;  %s661_s2 = inlined_call_operand.vmem [shape: f32[1,256], index: 2, kind: input, shape index: {}]   ;;  %s662_s3 = inlined_call_operand.vmem [shape: bf16[256,128], index: 3, kind: input, shape index: {}]   ;;  %s663_s4 = inlined_call_operand.vmem [shape: f32[1,128], index: 4, kind: input, shape index: {}]   ;;  %s664_s5 = inlined_call_operand.vmem [shape: f32[128,8], index: 5, kind: input, shape index: {}]   ;;  %s665_s6 = inlined_call_operand.vmem [shape: f32[1,8], index: 6, kind: input, shape index: {}]   ;;  %s666_s7 = inlined_call_operand.hbm [shape: f32[8,8], index: 7, kind: output, shape index: {}]  }
   0x1   :  { %13 = vsyncpa [#allocation4], 0  ;;  %s20_s26 = sshll.u32 %s660_s1, 4  ;;  %s501_s27 = smov [#allocation2]   ;;  %s21_s26 = int_to_ptr.hbm [resolvable:$true] %s20_s26 }
   0x2   :  { %s22_s28 = sshll.u32 %s501_s27, 4  ;;  %s502_s29 = smov 128   ;;  %s23_s28 = int_to_ptr.vmem [resolvable:$true] %s22_s28 }
   0x3   :  { %s503_s30 = smov 8  }
   0x4   :  { %28 = dma.hbm_to_vmem [thread:$0]  %s21_s26, 512, %s23_s28, [#allocation3], %s502_s29, %s502_s29, %s503_s30  }
   0x5   :  { %497 = dma.done.wait [#allocation3], 512  }
   0x6   :  { %498 = vsyncadd [#allocation3], 4294966784  ;;  %v343_v0 = vld [vmem:[#allocation2 + $0x10] sm:$0xf]  ;;  %v418_v1 = vld [vmem:[#allocation2 + $0x14] sm:$0xf0] }
   0x7   :  { %v335_v2 = vld [vmem:[#allocation2] sm:$0xf]  ;;  %v344_v3 = vor.u32 %v418_v1, %v343_v0  ;;  %v416_v4 = vld [vmem:[#allocation2 + $0x4] sm:$0xf0]  ;;  %v417_v5 = vld [vmem:[#allocation2 + $0x14] sm:$0xf] }
   0x8   :  { %v345_v6 = vld [vmem:[#allocation2 + $0x18] sm:$0xf0]  ;;  %v336_v7 = vor.u32 %v416_v4, %v335_v2  ;;  %v44_v8 = vld [vmem:[%s659_s0] sm:$0xff]  ;;  %v337_v12 = vld [vmem:[#allocation2 + $0x8] sm:$0xf0]  ;;  %vm76_vm0 = vcmask 261120   ;;  %v309_v4 = vlaneseq }
   0x9   :  { %86 = vmatpush.bf16.msra.mxu1 %v344_v3  ;;  %v426_v9 = vld [vmem:[%s662_s3 + $0x38] sm:$0xff]  ;;  %v348_v10 = vor.u32 %v417_v5, %v345_v6  ;;  %v415_v11 = vld [vmem:[#allocation2 + $0x4] sm:$0xf]  ;;  %v425_v14 = vld [vmem:[%s662_s3 + $0x30] sm:$0xff]  ;;  %v45_v15 = vpack.c.bf16 %v44_v8, %v44_v8  ;;  %s323_s26 = sshll.u32 %s666_s7, 4  ;;  %vm314_vm2 = vcmask 64512   ;;  %s324_s26 = int_to_ptr.hbm [resolvable:$true] %s323_s26 }
   0xa   :  { %v434_v13 = vld [vmem:[%s662_s3 + $0x78] sm:$0xff]  ;;  %242 = vmatpush.bf16.msra.mxu2 %v426_v9  ;;  %v340_v16 = vor.u32 %v415_v11, %v337_v12  ;;  %v424_v17 = vld [vmem:[%s662_s3 + $0x28] sm:$0xff]  ;;  %v423_v18 = vld [vmem:[%s662_s3 + $0x20] sm:$0xff] }
   0xb   :  { %255 = vmatpush.bf16.msra.mxu3 %v434_v13  ;;  %v422_v19 = vld [vmem:[%s662_s3 + $0x18] sm:$0xff]  ;;  %v421_v20 = vld [vmem:[%s662_s3 + $0x10] sm:$0xff]  ;;  %v420_v22 = vld [vmem:[%s662_s3 + $0x8] sm:$0xff] }
   0xc   :  { %v433_v21 = vld [vmem:[%s662_s3 + $0x70] sm:$0xff]  ;;  %v432_v23 = vld [vmem:[%s662_s3 + $0x68] sm:$0xff]  ;;  %v419_v24 = vld [vmem:[%s662_s3] sm:$0xff] }
   0xd   :  { %87 = vmatpush.bf16.msra.mxu1 %v336_v7  ;;  %v431_v25 = vld [vmem:[%s662_s3 + $0x60] sm:$0xff]  ;;  %v430_v26 = vld [vmem:[%s662_s3 + $0x58] sm:$0xff]  ;;  %v429_v27 = vld [vmem:[%s662_s3 + $0x50] sm:$0xff]  ;;  %v310_v7 = vand.u32 127, %v309_v4 }
   0xe   :  { %243 = vmatpush.bf16.msra.mxu2 %v425_v14  ;;  %v428_v28 = vld [vmem:[%s662_s3 + $0x48] sm:$0xff]  ;;  %v427_v29 = vld [vmem:[%s662_s3 + $0x40] sm:$0xff]  ;;  %v284_v31 = vld [vmem:[%s664_s5 + $0x78] sm:$0xff] }
   0xf   :  { %256 = vmatpush.bf16.msra.mxu3 %v433_v21  ;;  %v50_v30 = vld [vmem:[%s661_s2] sm:$0x3]  ;;  %v283_v32 = vld [vmem:[%s664_s5 + $0x70] sm:$0xff]  ;;  %289 = vmatpush.msra.mxu0 %v284_v31  ;;  %v282_v34 = vld [vmem:[%s664_s5 + $0x68] sm:$0xff]  ;;  %vm311_vm1 = vcmp.lt.s32.totalorder %v310_v7, 2 }
  0x10   :  { %349 = vmatmul.msk.bf16.vlgmr.msra.gmra.mxu1 %vm76_vm0, %v45_v15  ;;  %v52_v33 = vperm.slane %v50_v30, 0  ;;  %v53_v40 = vperm.slane %v50_v30, 1  ;;  %v281_v46 = vld [vmem:[%s664_s5 + $0x60] sm:$0xff]  ;;  %v280_v47 = vld [vmem:[%s664_s5 + $0x58] sm:$0xff]  ;;  %v279_v48 = vld [vmem:[%s664_s5 + $0x50] sm:$0xff] }
  0x11   :  { %99 = vmatpush.bf16.msrb.mxu1 %v348_v10  ;;  %290 = vmatpush.msra.mxu0 %v283_v32  ;;  %v278_v49 = vld [vmem:[%s664_s5 + $0x48] sm:$0xff]  ;;  %v277_v50 = vld [vmem:[%s664_s5 + $0x40] sm:$0xff]  ;;  %v276_v51 = vld [vmem:[%s664_s5 + $0x38] sm:$0xff] }
  0x12   :  { %244 = vmatpush.bf16.msra.mxu2 %v424_v17  ;;  %v275_v52 = vld [vmem:[%s664_s5 + $0x30] sm:$0xff]  ;;  %v274_v53 = vld [vmem:[%s664_s5 + $0x28] sm:$0xff]  ;;  %v273_v54 = vld [vmem:[%s664_s5 + $0x20] sm:$0xff] }
  0x13   :  { %257 = vmatpush.bf16.msra.mxu3 %v432_v23  ;;  %291 = vmatpush.msra.mxu0 %v282_v34  ;;  %v272_v55 = vld [vmem:[%s664_s5 + $0x18] sm:$0xff]  ;;  %v271_v56 = vld [vmem:[%s664_s5 + $0x10] sm:$0xff]  ;;  %v270_v57 = vld [vmem:[%s664_s5 + $0x8] sm:$0xff] }
  0x14   :  { %v269_v58 = vld [vmem:[%s664_s5] sm:$0xff]  ;;  %s504_s5 = smov [#allocation5]  }
  0x15   :  { %100 = vmatpush.bf16.msrb.mxu1 %v340_v16  ;;  %292 = vmatpush.msra.mxu0 %v281_v46  ;;  %v439_v61 = vld [vmem:[%s663_s4] ss:$0 sm:$0xff]  ;;  %s321_s24 = sshll.u32 %s504_s5, 4  ;;  %s322_s24 = int_to_ptr.vmem [resolvable:$true] %s321_s24 }
  0x16   :  { %245 = vmatpush.bf16.msra.mxu2 %v423_v18  ;;  %v440_v3 = vld [vmem:[%s665_s6] ss:$0 sm:$0xff] }
  0x17   :  { %258 = vmatpush.bf16.msra.mxu3 %v431_v25  ;;  %293 = vmatpush.msra.mxu0 %v280_v47 }
  0x19   :  { %294 = vmatpush.msra.mxu0 %v279_v48 }
  0x1a   :  { %246 = vmatpush.bf16.msra.mxu2 %v422_v19 }
  0x1b   :  { %259 = vmatpush.bf16.msra.mxu3 %v430_v26  ;;  %295 = vmatpush.msra.mxu0 %v278_v49 }
  0x1d   :  { %296 = vmatpush.msra.mxu0 %v277_v50 }
  0x1e   :  { %247 = vmatpush.bf16.msra.mxu2 %v421_v20 }
  0x1f   :  { %260 = vmatpush.bf16.msra.mxu3 %v429_v27  ;;  %297 = vmatpush.msra.mxu0 %v276_v51 }
  0x20   :  { %350 = vmatmul.msk.bf16.vlgmr.msrb.gmra.mxu1 %vm76_vm0, %v45_v15 }
  0x21   :  { %298 = vmatpush.msra.mxu0 %v275_v52 }
  0x22   :  { %248 = vmatpush.bf16.msra.mxu2 %v420_v22 }
  0x23   :  { %261 = vmatpush.bf16.msra.mxu3 %v428_v28  ;;  %299 = vmatpush.msra.mxu0 %v274_v53 }
  0x25   :  { %300 = vmatpush.msra.mxu0 %v273_v54 }
  0x26   :  { %249 = vmatpush.bf16.msra.mxu2 %v419_v24 }
  0x27   :  { %262 = vmatpush.bf16.msra.mxu3 %v427_v29  ;;  %301 = vmatpush.msra.mxu0 %v272_v55 }
  0x29   :  { %302 = vmatpush.msra.mxu0 %v271_v56 }
  0x2b   :  { %303 = vmatpush.msra.mxu0 %v270_v57 }
  0x2d   :  { %304 = vmatpush.msra.mxu0 %v269_v58 }
  0x8d   :  { %v89_v35 = vpop.f32.mrf.mxu1 }
  0x8e   :  { %v90_v36 = vadd.f32 %v89_v35, %v52_v33 }
  0x90   :  { %441 = vtanh.f32 %v90_v36 }
  0x95   :  { %v91_v37 = vpop.f32.mrf.mxu1 }
  0x96   :  { %v442_v38 = vpop.eup %441 }
  0x97   :  { %v108_v39 = vpack.c.bf16 %v442_v38, %v442_v38 }
  0x99   :  { %250 = vmatmul.bf16.vlgmr.msra.gmra.mxu2 %v108_v39 }
  0x9d   :  { %v102_v41 = vpop.f32.mrf.mxu1 }
  0x9e   :  { %v103_v42 = vadd.f32 %v102_v41, %v53_v40 }
  0xa0   :  { %443 = vtanh.f32 %v103_v42 }
  0xa5   :  { %v104_v43 = vpop.f32.mrf.mxu1 }
  0xa6   :  { %v444_v44 = vpop.eup %443 }
  0xa7   :  { %v109_v45 = vpack.c.bf16 %v444_v44, %v444_v44 }
  0xa9   :  { %263 = vmatmul.bf16.vlgmr.msra.gmra.mxu3 %v109_v45 }
 0x11c   :  { %v251_v59 = vpop.f32.mrf.mxu2 }
 0x11d   :  { %v252_v62 = vadd.f32 %v439_v61, %v251_v59 }
 0x124   :  { %v253_v60 = vpop.f32.mrf.mxu2 }
 0x12c   :  { %v264_v63 = vpop.f32.mrf.mxu3 }
 0x12d   :  { %v265_v0 = vadd.f32 %v264_v63, %v252_v62 }
 0x12f   :  { %445 = vtanh.f32 %v265_v0 }
 0x134   :  { %v266_v1 = vpop.f32.mrf.mxu3 }
 0x135   :  { %v446_v2 = vpop.eup %445 }
 0x136   :  { %305 = vmatmul.f32.vlgmr.msra.gmra.mxu0 %v446_v2 }
 0x1b3   :  { %v306_v5 = vpop.f32.mrf.mxu0 }
 0x1b4   :  { %v307_v6 = vadd.f32 %v440_v3, %v306_v5 }
 0x1b6   :  { %447 = vtanh.f32 %v307_v6 }
 0x1bc   :  { %v448_v8 = vpop.eup %447 }
 0x1bd   :  { %v313_v9 = vsel %vm311_vm1, %v448_v8, %v307_v6 }
 0x1be   :  { %315 = vst.msk [vmem:[#allocation5] sm:$0xff] %vm314_vm2, %v313_v9 }
 0x1bf   :  { %326 = dma.vmem_to_hbm [thread:$0]  %s322_s24, 128, %s324_s26, [#allocation4]  }
 0x1c0   :  { %499 = dma.done.wait [#allocation4], 128  }
 0x1c1   :  { %500 = vsyncadd [#allocation4], 4294967168 }
 0x1c2   :  { %331 = vsyncpa [#allocation3], 1 }
 0x1c3   :  { %332 = vsyncpa [#allocation4], 1 }

</bundles_post_ra>
